<compile_context>
chip_gen: v7x
topology: tpu7x:2x2x1
jax: 0.10.0
libtpu: 0.0.40
codegen_flags: <defaults>
</compile_context>

<pallas_src>
import functools
import math

import jax
import jax.numpy as jnp
from jax.experimental import pallas as pl
from jax.experimental.pallas import tpu as pltpu


_SQRT_HALF = 0.7071067811865476


def _erf(x):
    # Abramowitz & Stegun 7.1.26 rational approximation, |error| < 1.5e-7.
    a1, a2, a3, a4, a5 = (0.254829592, -0.284496736, 1.421413741,
                          -1.453152027, 1.061405429)
    p = 0.3275911
    ax = jnp.abs(x)
    # EUP approximate reciprocal: moves the divide off the VALU onto the
    # transcendental slot next to the exp below.
    t = pl.reciprocal(1.0 + p * ax, approx=True)
    poly = ((((a5 * t + a4) * t + a3) * t + a2) * t + a1) * t
    y = 1.0 - poly * jnp.exp(-ax * ax)
    return jnp.where(x < 0, -y, y)


def _gelu_exact(x):
    # Matches torch.nn.functional.gelu(x) (approximate='none').
    return 0.5 * x * (1.0 + _erf(x * _SQRT_HALF))


def _feedforward_kernel(x_ref, w1a_ref, w1b_ref, b1a_ref, b1b_ref,
                        w2_ref, b2_ref, o_ref, acc_ref, *, compute_dtype):
    # x_ref:   (block_m, C_in)      input row tile (original dtype)
    # w1a/w1b: (C_in, block_h)      GEGLU gate / gelu weight column chunks
    # b1a/b1b: (1, block_h)         f32 bias chunks
    # w2:      (block_h, C_out)     output-proj weight row chunk
    # b2:      (1, C_out)           f32
    # o_ref:   (block_m, C_out)     written only on the last hid chunk
    # acc_ref: (block_m, C_out) f32 VMEM accumulator (persists across hid axis)
    h_idx = pl.program_id(1)

    x = x_ref[...].astype(compute_dtype)

    # GEGLU for this hid chunk: x1 * gelu(x2), f32 accumulation on the MXU.
    x1 = jnp.dot(x, w1a_ref[...], preferred_element_type=jnp.float32) + b1a_ref[...]
    x2 = jnp.dot(x, w1b_ref[...], preferred_element_type=jnp.float32) + b1b_ref[...]
    g = x1 * _gelu_exact(x2)                      # (block_m, block_h) f32

    # TODO(synk): nn.Dropout(p=0.0) is the identity in the forward pass; omitted.

    @pl.when(h_idx == 0)
    def _init():
        acc_ref[...] = jnp.zeros_like(acc_ref)

    # Output projection for this hid chunk (chunkwise bf16 cast of g).
    acc_ref[...] += jnp.dot(g.astype(compute_dtype), w2_ref[...],
                            preferred_element_type=jnp.float32)

    @pl.when(h_idx == pl.num_programs(1) - 1)
    def _finalize():
        o_ref[...] = (acc_ref[...] + b2_ref[...]).astype(o_ref.dtype)


def _round_up(n, m):
    return ((n + m - 1) // m) * m


def _pick_block_h(hid, target):
    """Largest 128-multiple <= target that divides hid; else keep hid resident."""
    if hid <= target:
        return hid
    for cand in range(target, 127, -128):
        if hid % cand == 0:
            return cand
    return hid


def prepare_feedforward_params(w1, b1, w2, b2, *, compute_dtype=jnp.bfloat16):
    """One-time weight preprocessing (hoisted out of the forward path).

    Takes torch-layout nn.Linear parameters:
      w1: (2*hid, C_in)   GEGLU proj weight      b1: (2*hid,)
      w2: (C_out, hid)    output Linear weight   b2: (C_out,)
    Splits the GEGLU projection into gate/gelu halves, pre-transposes to
    [in, out], and casts matmul operands to `compute_dtype` (pass jnp.float32
    here for an f32-exact compute path at the cost of 2x weight bytes).
    """
    h2, c_in = w1.shape
    assert h2 % 2 == 0
    hid = h2 // 2
    c_out, hid_w2 = w2.shape
    assert hid_w2 == hid and b1.shape == (h2,) and b2.shape == (c_out,)

    w1_t = jnp.transpose(w1)                       # (C_in, 2*hid)
    return dict(
        w1a=jnp.asarray(w1_t[:, :hid], compute_dtype),     # gate half
        w1b=jnp.asarray(w1_t[:, hid:], compute_dtype),     # gelu half
        b1a=jnp.asarray(b1[:hid].reshape(1, hid), jnp.float32),
        b1b=jnp.asarray(b1[hid:].reshape(1, hid), jnp.float32),
        w2t=jnp.asarray(jnp.transpose(w2), compute_dtype),  # (hid, C_out)
        b2=jnp.asarray(b2.reshape(1, c_out), jnp.float32),
    )


def feedforward_forward(x, params, *, block_m=256, block_h=512):
    """FeedForward forward pass.  x: (..., C_in); params from
    prepare_feedforward_params()."""
    w1a, w1b = params["w1a"], params["w1b"]
    b1a, b1b = params["b1a"], params["b1b"]
    w2t, b2 = params["w2t"], params["b2"]
    compute_dtype = w1a.dtype

    c_in, hid = w1a.shape
    c_out = w2t.shape[1]
    assert x.shape[-1] == c_in

    # Fold all leading dims into the matmul M dimension.
    lead = x.shape[:-1]
    m = int(math.prod(lead)) if lead else 1
    x2d = x.reshape(m, c_in)

    # Row tile: MXU-friendly (default 256; a 128-multiple for v5e's 4x128 MXU,
    # consider 512 on v6e for very large M).  For tiny problems use one full
    # block, rounded to >=16 sublanes so bf16 min-tile rules stay satisfied.
    bm = block_m if m >= block_m else max(_round_up(m, 16), 16)
    m_pad = _round_up(m, bm)
    if m_pad != m:
        x2d = jnp.pad(x2d, ((0, m_pad - m), (0, 0)))   # padded rows: throwaway
    grid_m = m_pad // bm

    # Hidden-axis chunking.  Keep weights fully resident when they fit easily
    # in every chip's VMEM (budgeting double-buffering); otherwise stream.
    cbytes = jnp.dtype(compute_dtype).itemsize
    resident_weight_bytes = 2 * (2 * c_in * hid + hid * c_out) * cbytes
    bh = hid if resident_weight_bytes <= (24 << 20) else _pick_block_h(hid, block_h)
    grid_h = hid // bh

    # Explicit VMEM budget (double buffers for all pipelined operands +
    # accumulator scratch), with headroom; capped below v7x's 64 MiB physical.
    x_bytes = jnp.dtype(x.dtype).itemsize
    vmem_need = (
        2 * bm * c_in * x_bytes            # x row tile
        + 2 * 2 * c_in * bh * cbytes       # w1a + w1b column chunks
        + 2 * 2 * bh * 4                   # b1a + b1b chunks
        + 2 * bh * c_out * cbytes          # w2 row chunk
        + 2 * c_out * 4                    # b2
        + 2 * bm * c_out * x_bytes         # output tile
        + bm * c_out * 4                   # f32 accumulator scratch
    )
    vmem_limit = min(max(int(vmem_need * 1.5) + (2 << 20), 32 << 20), 64 << 20)

    kernel = functools.partial(_feedforward_kernel, compute_dtype=compute_dtype)

    out = pl.pallas_call(
        kernel,
        out_shape=jax.ShapeDtypeStruct((m_pad, c_out), x.dtype),
        grid_spec=pltpu.PrefetchScalarGridSpec(
            num_scalar_prefetch=0,
            grid=(grid_m, grid_h),                       # hid (reduction) last
            in_specs=[
                pl.BlockSpec((bm, c_in), lambda i, h: (i, 0)),    # x row tile
                pl.BlockSpec((c_in, bh), lambda i, h: (0, h)),    # W1a chunk
                pl.BlockSpec((c_in, bh), lambda i, h: (0, h)),    # W1b chunk
                pl.BlockSpec((1, bh), lambda i, h: (0, h)),       # b1a chunk
                pl.BlockSpec((1, bh), lambda i, h: (0, h)),       # b1b chunk
                pl.BlockSpec((bh, c_out), lambda i, h: (h, 0)),   # W2 chunk
                pl.BlockSpec((1, c_out), lambda i, h: (0, 0)),    # b2
            ],
            out_specs=pl.BlockSpec((bm, c_out), lambda i, h: (i, 0)),
            scratch_shapes=[pltpu.VMEM((bm, c_out), jnp.float32)],
        ),
        compiler_params=pltpu.CompilerParams(
            dimension_semantics=("parallel", "arbitrary"),
            vmem_limit_bytes=vmem_limit),
    )(x2d, w1a, w1b, b1a, b1b, w2t, b2)

    if m_pad != m:
        out = out[:m]
    return out.reshape(*lead, c_out)


def feedforward_reference(x, w1, b1, w2, b2):
    """Pure-JAX f32 reference matching the PyTorch forward exactly."""
    h = x @ w1.T + b1
    hid = w1.shape[0] // 2
    x1, x2 = h[..., :hid], h[..., hid:]
    h = x1 * jax.nn.gelu(x2, approximate=False)
    return h @ w2.T + b2


if __name__ == "__main__":
    # Small shapes consistent with the module: batch=2, seq=8, features=32.
    B, T = 2, 8
    in_features, out_features = 32, 32
    hid = 4 * out_features                 # 128
    dtype = jnp.float32

    key = jax.random.PRNGKey(0)
    kx, kw1, kb1, kw2, kb2 = jax.random.split(key, 5)

    x = jax.random.normal(kx, (B, T, in_features), dtype=dtype)

    # torch nn.Linear layouts: weight [out, in].
    w1 = jax.random.normal(kw1, (2 * hid, in_features), dtype=dtype) / math.sqrt(in_features)
    b1 = jax.random.normal(kb1, (2 * hid,), dtype=dtype) * 0.1
    w2 = jax.random.normal(kw2, (out_features, hid), dtype=dtype) / math.sqrt(hid)
    b2 = jax.random.normal(kb2, (out_features,), dtype=dtype) * 0.1

    # Weight preprocessing happens once, outside the forward path.
    params = prepare_feedforward_params(w1, b1, w2, b2)

    out = feedforward_forward(x, params)
    out = jax.block_until_ready(out)

    ref = feedforward_reference(x, w1, b1, w2, b2)
    assert out.shape == (B, T, out_features)
    max_err = float(jnp.max(jnp.abs(out - ref)))
    # bf16 matmul operands (f32 accumulation) -> loosened tolerance vs f32 ref.
    assert max_err < 5e-2, f"mismatch vs reference, max_err={max_err}"

    print("KERNEL_OK")
</pallas_src>

<mosaic_0001>
module attributes {stable_mosaic.version = 11 : i64} {
  func.func @_feedforward_kernel(%arg0: i32, %arg1: i32, %arg2: memref<16x32xf32, #tpu.memory_space<vmem>>, %arg3: memref<32x128xbf16, #tpu.memory_space<vmem>>, %arg4: memref<32x128xbf16, #tpu.memory_space<vmem>>, %arg5: memref<1x128xf32, #tpu.memory_space<vmem>>, %arg6: memref<1x128xf32, #tpu.memory_space<vmem>>, %arg7: memref<128x32xbf16, #tpu.memory_space<vmem>>, %arg8: memref<1x32xf32, #tpu.memory_space<vmem>>, %arg9: memref<16x32xf32, #tpu.memory_space<vmem>>, %arg10: memref<16x32xf32, #tpu.memory_space<vmem>>) attributes {dimension_semantics = [#tpu.dimension_semantics<parallel>, #tpu.dimension_semantics<arbitrary>], iteration_bounds = array<i64: 1, 1>, scalar_prefetch = 0 : i64, scratch_operands = 1 : i64, tpu.core_type = #tpu.core_type<tc>, window_params = [{transform_indices = @transform_0, window_bounds = array<i64: 16, 32>}, {transform_indices = @transform_1, window_bounds = array<i64: 32, 128>}, {transform_indices = @transform_2, window_bounds = array<i64: 32, 128>}, {transform_indices = @transform_3, window_bounds = array<i64: 1, 128>}, {transform_indices = @transform_4, window_bounds = array<i64: 1, 128>}, {transform_indices = @transform_5, window_bounds = array<i64: 128, 32>}, {pipeline_mode = #tpu.pipeline_mode<synchronous>, transform_indices = @transform_6, window_bounds = array<i64: 1, 32>}, {transform_indices = @transform_7, window_bounds = array<i64: 16, 32>}]} {
    %c0 = arith.constant 0 : index
    %c0_0 = arith.constant 0 : index
    %0 = vector.load %arg2[%c0, %c0_0] : memref<16x32xf32, #tpu.memory_space<vmem>>, vector<16x32xf32>
    %1 = arith.truncf %0 : vector<16x32xf32> to vector<16x32xbf16>
    %c0_1 = arith.constant 0 : index
    %c0_2 = arith.constant 0 : index
    %2 = vector.load %arg3[%c0_1, %c0_2] : memref<32x128xbf16, #tpu.memory_space<vmem>>, vector<32x128xbf16>
    %cst = arith.constant dense<0.000000e+00> : vector<16x128xf32>
    %3 = tpu.matmul %1, %2, %cst {dimension_numbers = #tpu.dot_dimension_numbers<[1], [0], [0], [1], [0, 0, 1, 1], [], []>} : vector<16x32xbf16>, vector<32x128xbf16>, vector<16x128xf32> -> vector<16x128xf32>
    %c0_3 = arith.constant 0 : index
    %c0_4 = arith.constant 0 : index
    %4 = vector.load %arg5[%c0_3, %c0_4] : memref<1x128xf32, #tpu.memory_space<vmem>>, vector<1x128xf32>
    %5 = vector.broadcast %4 : vector<1x128xf32> to vector<16x128xf32>
    %6 = arith.addf %3, %5 : vector<16x128xf32>
    %c0_5 = arith.constant 0 : index
    %c0_6 = arith.constant 0 : index
    %7 = vector.load %arg4[%c0_5, %c0_6] : memref<32x128xbf16, #tpu.memory_space<vmem>>, vector<32x128xbf16>
    %cst_7 = arith.constant dense<0.000000e+00> : vector<16x128xf32>
    %8 = tpu.matmul %1, %7, %cst_7 {dimension_numbers = #tpu.dot_dimension_numbers<[1], [0], [0], [1], [0, 0, 1, 1], [], []>} : vector<16x32xbf16>, vector<32x128xbf16>, vector<16x128xf32> -> vector<16x128xf32>
    %c0_8 = arith.constant 0 : index
    %c0_9 = arith.constant 0 : index
    %9 = vector.load %arg6[%c0_8, %c0_9] : memref<1x128xf32, #tpu.memory_space<vmem>>, vector<1x128xf32>
    %10 = vector.broadcast %9 : vector<1x128xf32> to vector<16x128xf32>
    %11 = arith.addf %8, %10 : vector<16x128xf32>
    %cst_10 = arith.constant 5.000000e-01 : f32
    %12 = vector.broadcast %cst_10 : f32 to vector<16x128xf32>
    %13 = arith.mulf %12, %11 : vector<16x128xf32>
    %cst_11 = arith.constant 0.707106769 : f32
    %14 = vector.broadcast %cst_11 : f32 to vector<16x128xf32>
    %15 = arith.mulf %11, %14 : vector<16x128xf32>
    %16 = math.absf %15 : vector<16x128xf32>
    %cst_12 = arith.constant 0.327591091 : f32
    %17 = vector.broadcast %cst_12 : f32 to vector<16x128xf32>
    %18 = arith.mulf %17, %16 : vector<16x128xf32>
    %cst_13 = arith.constant 1.000000e+00 : f32
    %19 = vector.broadcast %cst_13 : f32 to vector<16x128xf32>
    %20 = arith.addf %19, %18 : vector<16x128xf32>
    %21 = tpu.reciprocal %20 {approx = true} : vector<16x128xf32> -> vector<16x128xf32>
    %cst_14 = arith.constant 1.06140542 : f32
    %22 = vector.broadcast %cst_14 : f32 to vector<16x128xf32>
    %23 = arith.mulf %22, %21 : vector<16x128xf32>
    %cst_15 = arith.constant -1.45315206 : f32
    %24 = vector.broadcast %cst_15 : f32 to vector<16x128xf32>
    %25 = arith.addf %23, %24 : vector<16x128xf32>
    %26 = arith.mulf %25, %21 : vector<16x128xf32>
    %cst_16 = arith.constant 1.42141378 : f32
    %27 = vector.broadcast %cst_16 : f32 to vector<16x128xf32>
    %28 = arith.addf %26, %27 : vector<16x128xf32>
    %29 = arith.mulf %28, %21 : vector<16x128xf32>
    %cst_17 = arith.constant -0.284496725 : f32
    %30 = vector.broadcast %cst_17 : f32 to vector<16x128xf32>
    %31 = arith.addf %29, %30 : vector<16x128xf32>
    %32 = arith.mulf %31, %21 : vector<16x128xf32>
    %cst_18 = arith.constant 0.254829586 : f32
    %33 = vector.broadcast %cst_18 : f32 to vector<16x128xf32>
    %34 = arith.addf %32, %33 : vector<16x128xf32>
    %35 = arith.mulf %34, %21 : vector<16x128xf32>
    %cst_19 = arith.constant 0.000000e+00 : f32
    %36 = vector.broadcast %cst_19 : f32 to vector<16x128xf32>
    %37 = arith.subf %36, %16 : vector<16x128xf32>
    %38 = arith.mulf %37, %16 : vector<16x128xf32>
    %39 = math.exp %38 : vector<16x128xf32>
    %40 = arith.mulf %35, %39 : vector<16x128xf32>
    %cst_20 = arith.constant 1.000000e+00 : f32
    %41 = vector.broadcast %cst_20 : f32 to vector<16x128xf32>
    %42 = arith.subf %41, %40 : vector<16x128xf32>
    %cst_21 = arith.constant 0.000000e+00 : f32
    %43 = vector.broadcast %cst_21 : f32 to vector<16x128xf32>
    %44 = arith.cmpf olt, %15, %43 : vector<16x128xf32>
    %cst_22 = arith.constant 0.000000e+00 : f32
    %45 = vector.broadcast %cst_22 : f32 to vector<16x128xf32>
    %46 = arith.subf %45, %42 : vector<16x128xf32>
    %47 = arith.select %44, %46, %42 : vector<16x128xi1>, vector<16x128xf32>
    %cst_23 = arith.constant 1.000000e+00 : f32
    %48 = vector.broadcast %cst_23 : f32 to vector<16x128xf32>
    %49 = arith.addf %48, %47 : vector<16x128xf32>
    %50 = arith.mulf %13, %49 : vector<16x128xf32>
    %51 = arith.mulf %6, %50 : vector<16x128xf32>
    %c0_i32 = arith.constant 0 : i32
    %52 = arith.cmpi eq, %arg1, %c0_i32 : i32
    %53 = arith.extui %52 : i1 to i32
    %c0_i32_24 = arith.constant 0 : i32
    %54 = arith.cmpi ne, %53, %c0_i32_24 : i32
    scf.if %54 {
      %cst_34 = arith.constant 0.000000e+00 : f32
      %64 = vector.broadcast %cst_34 : f32 to vector<16x32xf32>
      %c0_35 = arith.constant 0 : index
      %c0_36 = arith.constant 0 : index
      %65 = vector.load %arg10[%c0_35, %c0_36] : memref<16x32xf32, #tpu.memory_space<vmem>>, vector<16x32xf32>
      tpu.vector_store %arg10[%c0_35, %c0_36], %64 {strides = array<i32>} : memref<16x32xf32, #tpu.memory_space<vmem>>, vector<16x32xf32>,
    } else {
    }
    %c0_25 = arith.constant 0 : index
    %c0_26 = arith.constant 0 : index
    %55 = vector.load %arg10[%c0_25, %c0_26] : memref<16x32xf32, #tpu.memory_space<vmem>>, vector<16x32xf32>
    %56 = arith.truncf %51 : vector<16x128xf32> to vector<16x128xbf16>
    %c0_27 = arith.constant 0 : index
    %c0_28 = arith.constant 0 : index
    %57 = vector.load %arg7[%c0_27, %c0_28] : memref<128x32xbf16, #tpu.memory_space<vmem>>, vector<128x32xbf16>
    %cst_29 = arith.constant dense<0.000000e+00> : vector<16x32xf32>
    %58 = tpu.matmul %56, %57, %cst_29 {dimension_numbers = #tpu.dot_dimension_numbers<[1], [0], [0], [1], [0, 0, 1, 1], [], []>} : vector<16x128xbf16>, vector<128x32xbf16>, vector<16x32xf32> -> vector<16x32xf32>
    %59 = arith.addf %55, %58 : vector<16x32xf32>
    %c0_30 = arith.constant 0 : index
    %c0_31 = arith.constant 0 : index
    %60 = vector.load %arg10[%c0_30, %c0_31] : memref<16x32xf32, #tpu.memory_space<vmem>>, vector<16x32xf32>
    tpu.vector_store %arg10[%c0_30, %c0_31], %59 {strides = array<i32>} : memref<16x32xf32, #tpu.memory_space<vmem>>, vector<16x32xf32>,
    %c0_i32_32 = arith.constant 0 : i32
    %61 = arith.cmpi eq, %arg1, %c0_i32_32 : i32
    %62 = arith.extui %61 : i1 to i32
    %c0_i32_33 = arith.constant 0 : i32
    %63 = arith.cmpi ne, %62, %c0_i32_33 : i32
    scf.if %63 {
      %c0_34 = arith.constant 0 : index
      %c0_35 = arith.constant 0 : index
      %64 = vector.load %arg10[%c0_34, %c0_35] : memref<16x32xf32, #tpu.memory_space<vmem>>, vector<16x32xf32>
      %c0_36 = arith.constant 0 : index
      %c0_37 = arith.constant 0 : index
      %65 = vector.load %arg8[%c0_36, %c0_37] : memref<1x32xf32, #tpu.memory_space<vmem>>, vector<1x32xf32>
      %66 = vector.broadcast %65 : vector<1x32xf32> to vector<16x32xf32>
      %67 = arith.addf %64, %66 : vector<16x32xf32>
      %c0_38 = arith.constant 0 : index
      %c0_39 = arith.constant 0 : index
      %68 = vector.load %arg9[%c0_38, %c0_39] : memref<16x32xf32, #tpu.memory_space<vmem>>, vector<16x32xf32>
      tpu.vector_store %arg9[%c0_38, %c0_39], %67 {strides = array<i32>} : memref<16x32xf32, #tpu.memory_space<vmem>>, vector<16x32xf32>,
    } else {
    }
    return
  }
  func.func @transform_0(%arg0: i32, %arg1: i32) -> (i32, i32) {
    %c0_i32 = arith.constant 0 : i32
    %c0_i32_0 = arith.constant 0 : i32
    return %arg0, %c0_i32 : i32, i32
  }
  func.func @transform_1(%arg0: i32, %arg1: i32) -> (i32, i32) {
    %c0_i32 = arith.constant 0 : i32
    %c0_i32_0 = arith.constant 0 : i32
    return %c0_i32, %arg1 : i32, i32
  }
  func.func @transform_2(%arg0: i32, %arg1: i32) -> (i32, i32) {
    %c0_i32 = arith.constant 0 : i32
    %c0_i32_0 = arith.constant 0 : i32
    return %c0_i32, %arg1 : i32, i32
  }
  func.func @transform_3(%arg0: i32, %arg1: i32) -> (i32, i32) {
    %c0_i32 = arith.constant 0 : i32
    %c0_i32_0 = arith.constant 0 : i32
    return %c0_i32, %arg1 : i32, i32
  }
  func.func @transform_4(%arg0: i32, %arg1: i32) -> (i32, i32) {
    %c0_i32 = arith.constant 0 : i32
    %c0_i32_0 = arith.constant 0 : i32
    return %c0_i32, %arg1 : i32, i32
  }
  func.func @transform_5(%arg0: i32, %arg1: i32) -> (i32, i32) {
    %c0_i32 = arith.constant 0 : i32
    %c0_i32_0 = arith.constant 0 : i32
    return %arg1, %c0_i32 : i32, i32
  }
  func.func @transform_6(%arg0: i32, %arg1: i32) -> (i32, i32) {
    %c0_i32 = arith.constant 0 : i32
    %c0_i32_0 = arith.constant 0 : i32
    %c0_i32_1 = arith.constant 0 : i32
    return %c0_i32, %c0_i32_0 : i32, i32
  }
  func.func @transform_7(%arg0: i32, %arg1: i32) -> (i32, i32) {
    %c0_i32 = arith.constant 0 : i32
    %c0_i32_0 = arith.constant 0 : i32
    return %arg0, %c0_i32 : i32, i32
  }
}

</mosaic_0001>

<bundles_post_ra>
// kernel: tpu_custom_call.1
= control target key start
LH: loop header
LB: loop body
LE: loop exit
PB: predicated region body
PF: predicated region fallthrough
CT: control target
= control target key end

     0   :  { %v484_v1 = vmov 0.0   ;;  %vm485_vm0 = vmmov 0   ;;  %vm54_vm1 = vcmask 261120   ;;  %s609_s0 = inlined_call_operand.vmem [shape: f32[16,32], index: 0, kind: input, shape index: {}]   ;;  %s610_s1 = inlined_call_operand.vmem [shape: bf16[32,128], index: 1, kind: input, shape index: {}]   ;;  %s611_s2 = inlined_call_operand.vmem [shape: bf16[32,128], index: 2, kind: input, shape index: {}]   ;;  %s612_s3 = inlined_call_operand.vmem [shape: f32[1,128], index: 3, kind: input, shape index: {}]   ;;  %s613_s4 = inlined_call_operand.vmem [shape: f32[1,128], index: 4, kind: input, shape index: {}]   ;;  %s614_s5 = inlined_call_operand.vmem [shape: bf16[128,32], index: 5, kind: input, shape index: {}]   ;;  %s615_s6 = inlined_call_operand.vmem [shape: f32[1,32], index: 6, kind: input, shape index: {}]   ;;  %s616_s7 = inlined_call_operand.hbm [shape: f32[16,32], index: 7, kind: output, shape index: {}]  }
   0x1   :  { %v440_v0 = vld [vmem:[%s610_s1] sm:$0xff]   ;;  %399 = vmatprep.subr.bf16.mxu1 %v484_v1  ;;  %v441_v2 = vld [vmem:[%s610_s1 + $0x8] sm:$0xff]   ;;  %415 = vmatprep.subr.bf16.mxu0 %v484_v1  ;;  %221 = vst.msk [vmem:[#allocation2] sm:$0xff] %vm54_vm1, %v484_v1  ;;  %222 = vst.msk [vmem:[#allocation2 + $0x8] sm:$0xff] %vm54_vm1, %v484_v1 }
   0x2   :  { %400 = vmatpush3.bf16.msra.mxu1 %v440_v0  ;;  %403 = vmatprep.mubr.msk.bf16.mxu1 %vm485_vm0, %v484_v1  ;;  %v28_v3 = vld [vmem:[%s609_s0] sm:$0xff]  ;;  %v29_v4 = vld [vmem:[%s609_s0 + $0x8] sm:$0xff] }
   0x3   :  { %401 = vmatprep.subr.bf16.mxu1 %v484_v1  ;;  %431 = vmatprep.mubr.msk.bf16.mxu0 %vm485_vm0, %v484_v1  ;;  %v442_v5 = vld [vmem:[%s611_s2] sm:$0xff]   ;;  %v30_v6 = vpack.c.bf16 %v29_v4, %v28_v3  ;;  %v443_v7 = vld [vmem:[%s611_s2 + $0x8] sm:$0xff]  }
   0x6   :  { %402 = vmatpush3.bf16.msra.mxu1 %v441_v2 }
   0x7   :  { %407 = vmatprep.subr.bf16.mxu1 %v484_v1 }
   0x9   :  { %404 = vmatmul.mubr.msk.bf16.vlgmr.msra.gmra.mrb[0].mxu1 %vm54_vm1, %v30_v6 }
   0xa   :  { %408 = vmatpush3.bf16.msra.mxu1 %v442_v5  ;;  %411 = vmatprep.mubr.msk.bf16.mxu1 %vm485_vm0, %v484_v1 }
   0xb   :  { %12 = vsyncpa [#allocation4], 0  ;;  %409 = vmatprep.subr.bf16.mxu1 %v484_v1  ;;  %v444_v8 = vld [vmem:[%s614_s5] sm:$0xff]   ;;  %v445_v9 = vld [vmem:[%s614_s5 + $0x8] sm:$0xff]   ;;  %s486_s29 = smov [#allocation3]  }
   0xc   :  { %416 = vmatpush3.bf16.msra.mxu0 %v444_v8  ;;  %v446_v10 = vld [vmem:[%s614_s5 + $0x10] sm:$0xff]   ;;  %v447_v11 = vld [vmem:[%s614_s5 + $0x18] sm:$0xff]   ;;  %v448_v12 = vld [vmem:[%s614_s5 + $0x20] sm:$0xff]   ;;  %s356_s30 = sshll.u32 %s486_s29, 4  ;;  %s357_s30 = int_to_ptr.vmem [resolvable:$true] %s356_s30 }
   0xd   :  { %417 = vmatprep.subr.bf16.mxu0 %v484_v1  ;;  %v449_v13 = vld [vmem:[%s614_s5 + $0x28] sm:$0xff]   ;;  %v450_v14 = vld [vmem:[%s614_s5 + $0x30] sm:$0xff]   ;;  %v451_v15 = vld [vmem:[%s614_s5 + $0x38] sm:$0xff]   ;;  %s460_s8 = scalar_lea.vmem %s357_s30, 256  ;;  %p465_p1 = scmp.lt.s32.totalorder %s357_s30, %s357_s30 }
   0xe   :  { %410 = vmatpush3.bf16.msra.mxu1 %v443_v7  ;;  %v371_v20 = vld [vmem:[%s613_s4] ss:$0 sm:$0xff]  ;;  %p461_p0 = scmp.ne.s32.totalorder %s357_s30, %s460_s8  ;;  %p466_p2 = scmp.lt.s32.totalorder %s460_s8, %s460_s8 }
   0xf   :  { %v367_v4 = vld [vmem:[%s612_s3] ss:$0 sm:$0xff] }
  0x10   :  { %418 = vmatpush3.bf16.msra.mxu0 %v445_v9  ;;  %p467_p3 = por %p466_p2, %p465_p1 }
  0x11   :  { %412 = vmatmul.mubr.msk.bf16.vlgmr.msra.gmra.mrb[4].mxu1 %vm54_vm1, %v30_v6  ;;  %419 = vmatprep.subr.bf16.mxu0 %v484_v1 }
  0x12   :  { %p468_p4 = pnand %p467_p3, %p461_p0 }
  0x14   :  { %420 = vmatpush3.bf16.msra.mxu0 %v446_v10 }
  0x15   :  { %421 = vmatprep.subr.bf16.mxu0 %v484_v1 }
  0x18   :  { %422 = vmatpush3.bf16.msra.mxu0 %v447_v11 }
  0x19   :  { %423 = vmatprep.subr.bf16.mxu0 %v484_v1 }
  0x1c   :  { %424 = vmatpush3.bf16.msra.mxu0 %v448_v12 }
  0x1d   :  { %425 = vmatprep.subr.bf16.mxu0 %v484_v1 }
  0x20   :  { %426 = vmatpush3.bf16.msra.mxu0 %v449_v13 }
  0x21   :  { %427 = vmatprep.subr.bf16.mxu0 %v484_v1 }
  0x24   :  { %428 = vmatpush3.bf16.msra.mxu0 %v450_v14 }
  0x25   :  { %429 = vmatprep.subr.bf16.mxu0 %v484_v1 }
  0x28   :  { %430 = vmatpush3.bf16.msra.mxu0 %v451_v15 }
  0xdc   :  { %v578_v16 = vpop.f32.mrb[0].mxu1 }
  0xdd   :  { %v405_v17 = vpop.f32.mrb[1].mxu1  ;;  %v93_v9 = vadd.f32 %v367_v4, %v578_v16 }
  0xde   :  { %v580_v18 = vpop.f32.mrb[2].mxu1 }
  0xdf   :  { %v406_v19 = vpop.f32.mrb[3].mxu1  ;;  %v96_v15 = vadd.f32 %v367_v4, %v580_v18  ;;  %v383_v18 = vld [vmem:[%s615_s6] ss:$0 sm:$0xff] }
  0xe4   :  { %v156_v21 = vpop.f32.mrb[4].mxu1 }
  0xe5   :  { %v157_v22 = vadd.f32 %v371_v20, %v156_v21  ;;  %v413_v23 = vpop.f32.mrb[5].mxu1  ;;  %v223_v21 = vld [vmem:[#allocation2] sm:$0xff] }
  0xe6   :  { %v159_v24 = vpop.f32.mrb[6].mxu1 }
  0xe7   :  { %v165_v25 = vmul.f32 0.70710677, %v157_v22  ;;  %v160_v26 = vadd.f32 %v371_v20, %v159_v24  ;;  %v414_v27 = vpop.f32.mrb[7].mxu1  ;;  %v163_v6 = vmul.f32 0.5, %v157_v22  ;;  %v224_v24 = vld [vmem:[#allocation2 + $0x8] sm:$0xff] }
  0xe9   :  { %v167_v28 = vand.u32 2147483647, %v165_v25  ;;  %v166_v29 = vmul.f32 0.70710677, %v160_v26  ;;  %vm205_vm2 = vcmp.lt.f32.partialorder %v165_v25, 0.0  ;;  %v164_v12 = vmul.f32 0.5, %v160_v26 }
  0xeb   :  { %v169_v30 = vmul.f32 0.3275911, %v167_v28  ;;  %v168_v31 = vand.u32 2147483647, %v166_v29  ;;  %v193_v35 = vsub.f32 0.0, %v167_v28  ;;  %vm206_vm3 = vcmp.lt.f32.partialorder %v166_v29, 0.0 }
  0xed   :  { %v171_v32 = vadd.f32 1.0, %v169_v30  ;;  %v170_v33 = vmul.f32 0.3275911, %v168_v31  ;;  %v194_v36 = vsub.f32 0.0, %v168_v31  ;;  %v195_v38 = vmul.f32 %v193_v35, %v167_v28 }
  0xef   :  { %452 = vrcp.f32 %v171_v32  ;;  %v172_v34 = vadd.f32 1.0, %v170_v33  ;;  %v196_v42 = vmul.f32 %v194_v36, %v168_v31  ;;  %v197_v43 = vmul.f32 1.442695, %v195_v38 }
  0xf1   :  { %454 = vrcp.f32 %v172_v34  ;;  %v199_v48 = vmul.f32 1.442695, %v196_v42 }
  0xf2   :  { %456 = vpow2.f32 %v197_v43 }
  0xf3   :  { %458 = vpow2.f32 %v199_v48 }
  0xf9   :  { %v453_v37 = vpop.eup %452 }
  0xfa   :  { %v175_v39 = vmul.f32 1.0614054, %v453_v37 }
  0xfb   :  { %v455_v40 = vpop.eup %454 }
  0xfc   :  { %v177_v41 = vadd.f32 -1.4531521, %v175_v39  ;;  %v176_v44 = vmul.f32 1.0614054, %v455_v40  ;;  %v457_v59 = vpop.eup %456 }
  0xfd   :  { %v459_v63 = vpop.eup %458 }
  0xfe   :  { %v179_v45 = vmul.f32 %v453_v37, %v177_v41  ;;  %v178_v46 = vadd.f32 -1.4531521, %v176_v44 }
 0x100   :  { %v181_v47 = vadd.f32 1.4214138, %v179_v45  ;;  %v180_v49 = vmul.f32 %v455_v40, %v178_v46 }
 0x102   :  { %v183_v50 = vmul.f32 %v453_v37, %v181_v47  ;;  %v182_v51 = vadd.f32 1.4214138, %v180_v49 }
 0x104   :  { %v185_v52 = vadd.f32 -0.28449672, %v183_v50  ;;  %v184_v53 = vmul.f32 %v455_v40, %v182_v51 }
 0x106   :  { %v187_v54 = vmul.f32 %v453_v37, %v185_v52  ;;  %v186_v55 = vadd.f32 -0.28449672, %v184_v53 }
 0x108   :  { %v189_v56 = vadd.f32 0.2548296, %v187_v54  ;;  %v188_v57 = vmul.f32 %v455_v40, %v186_v55 }
 0x10a   :  { %v191_v58 = vmul.f32 %v453_v37, %v189_v56  ;;  %v190_v60 = vadd.f32 0.2548296, %v188_v57 }
 0x10c   :  { %v201_v61 = vmul.f32 %v457_v59, %v191_v58  ;;  %v192_v62 = vmul.f32 %v455_v40, %v190_v60 }
 0x10e   :  { %v203_v0 = vsub.f32 1.0, %v201_v61  ;;  %v202_v1 = vmul.f32 %v459_v63, %v192_v62 }
 0x110   :  { %v207_v2 = vsub.f32 0.0, %v203_v0  ;;  %v204_v3 = vsub.f32 1.0, %v202_v1 }
 0x112   :  { %v209_v5 = vsel %vm205_vm2, %v207_v2, %v203_v0  ;;  %v208_v8 = vsub.f32 0.0, %v204_v3 }
 0x113   :  { %v211_v7 = vadd.f32 1.0, %v209_v5 }
 0x114   :  { %v210_v11 = vsel %vm206_vm3, %v208_v8, %v204_v3 }
 0x115   :  { %v213_v10 = vmul.f32 %v211_v7, %v163_v6  ;;  %v212_v13 = vadd.f32 1.0, %v210_v11 }
 0x117   :  { %v215_v14 = vmul.f32 %v213_v10, %v93_v9  ;;  %v214_v17 = vmul.f32 %v212_v13, %v164_v12 }
 0x119   :  { %v216_v19 = vmul.f32 %v214_v17, %v96_v15 }
 0x11b   :  { %v225_v20 = vpack.c.bf16 %v216_v19, %v215_v14 }
 0x11d   :  { %432 = vmatmul.mubr.bf16.vlgmr.msra.gmra.mrb[0].mxu0 %v225_v20 }
 0x1f0   :  { %v324_v23 = vpop.f32.mrb[0].mxu0 }
 0x1f1   :  { %v331_v22 = vadd.f32 %v324_v23, %v223_v21  ;;  %v433_v25 = vpop.f32.mrb[1].mxu0 }
 0x1f2   :  { %v327_v27 = vpop.f32.mrb[2].mxu0 }
 0x1f3   :  { %333 = vst.msk [vmem:[#allocation2] sm:$0xff] %vm54_vm1, %v331_v22  ;;  %v332_v16 = vadd.f32 %v327_v27, %v224_v24  ;;  %v434_v28 = vpop.f32.mrb[3].mxu0 }
 0x1f5   :  { %334 = vst.msk [vmem:[#allocation2 + $0x8] sm:$0xff] %vm54_vm1, %v332_v16 }
 0x1fa   :  { %v338_v26 = vld [vmem:[#allocation2] sm:$0xff] }
 0x1fb   :  { %v347_v29 = vadd.f32 %v383_v18, %v338_v26 }
 0x1fc   :  { %v339_v30 = vld [vmem:[#allocation2 + $0x8] sm:$0xff] }
 0x1fd   :  { %v348_v31 = vadd.f32 %v383_v18, %v339_v30  ;;  %349 = vst.msk [vmem:[#allocation3] sm:$0xff] %vm54_vm1, %v347_v29 }
 0x1ff   :  { %350 = vst.msk [vmem:[#allocation3 + $0x8] sm:$0xff] %vm54_vm1, %v348_v31 }
 0x200   :  { %471 = shalt.err (!%p468_p4)
}
 0x201   :  { %s472_s9 = scalar_lea.hbm %s616_s7, 256 }
 0x202   :  { %p473_p5 = scmp.ne.s32.totalorder %s616_s7, %s472_s9  ;;  %p476_p6 = scmp.lt.u32.totalorder %s472_s9, %s616_s7 }
 0x204   :  { %p478_p7 = pnand %p476_p6, %p473_p5 }
 0x206   :  { %481 = shalt.err (!%p478_p7)
}
 0x207   :  { %s487_s13 = smov 128   ;;  %s488_s14 = smov 8  }
 0x208   :  { %362 = dma.vmem_to_hbm [thread:$0]  %s357_s30, 256, %s616_s7, [#allocation4], %s487_s13, %s487_s13, %s488_s14  }
 0x209   :  { %482 = dma.done.wait [#allocation4], 256  }
 0x20a   :  { %483 = vsyncadd [#allocation4], 4294967040 }
 0x20b   :  { %366 = vsyncpa [#allocation4], 1 }

</bundles_post_ra>
